<compile_context>
chip_gen: v5e
topology: v5e:2x2
jax: 0.10.0
libtpu: 0.0.40
codegen_flags: <defaults>
</compile_context>

<pallas_src>
import functools

import jax
import jax.numpy as jnp
from jax.experimental import pallas as pl
from jax.experimental.pallas import tpu as pltpu

LANE = 128
SUBLANE = 8


def _round_up(n, m):
    return ((n + m - 1) // m) * m


def _actor_critic_kernel(
    x_ref, w1_ref, b1_ref, wb_ref, bb_ref, wh_ref, bh_ref, out_ref, *, n_actions
):
    x = x_ref[...]

    # shared = relu(x @ W1 + b1)                                    [TB, H]
    shared = jnp.dot(x, w1_ref[...], preferred_element_type=jnp.float32) + b1_ref[...]
    shared = jnp.maximum(shared, 0.0)

    # fused actor/critic hidden = relu(shared @ [Wa1 | Wc1] + b)    [TB, 2H]
    branch = jnp.dot(shared, wb_ref[...], preferred_element_type=jnp.float32) + bb_ref[...]
    branch = jnp.maximum(branch, 0.0)

    # fused heads: lanes [0, n_actions) = logits, lane n_actions = value, rest 0
    heads = jnp.dot(branch, wh_ref[...], preferred_element_type=jnp.float32) + bh_ref[...]

    lane = jax.lax.broadcasted_iota(jnp.int32, heads.shape, 1)
    is_action = lane < n_actions
    is_value = lane == n_actions

    # numerically-stable softmax restricted to the action lanes
    logits = jnp.where(is_action, heads, -jnp.inf)
    m = jnp.max(logits, axis=-1, keepdims=True)
    e = jnp.exp(logits - m)                       # padded lanes -> exp(-inf) = 0
    denom = jnp.sum(e, axis=-1, keepdims=True)
    # exact reciprocal: keeps bit-level agreement with jax.nn.softmax at 1e-5
    probs = e * pl.reciprocal(denom, approx=False)

    # single lane-dense store: probs everywhere except the value lane
    out_ref[...] = jnp.where(is_value, heads, probs)


def prepare_params(params):
    """Fuse + zero-pad all weights once into (8,128)-aligned, lane-dense blocks."""
    w1, b1 = params["w1"], params["b1"]
    wa1, ba1 = params["wa1"], params["ba1"]
    wa2, ba2 = params["wa2"], params["ba2"]
    wc1, bc1 = params["wc1"], params["bc1"]
    wc2, bc2 = params["wc2"], params["bc2"]

    input_dim, hidden_dim = w1.shape
    n_actions = wa2.shape[1]

    d_in = _round_up(input_dim, LANE)
    h = _round_up(hidden_dim, LANE)
    out_p = _round_up(n_actions + 1, LANE)

    def pad2(a, rows, cols):
        return jnp.pad(a, ((0, rows - a.shape[0]), (0, cols - a.shape[1])))

    w1_p = pad2(w1, d_in, h)
    b1_p = pad2(b1, 1, h)

    # fused branch weight: output lanes [0, h) -> actor hidden, [h, 2h) -> critic hidden
    wb = jnp.concatenate([pad2(wa1, h, h), pad2(wc1, h, h)], axis=1)
    bb = jnp.concatenate([pad2(ba1, 1, h), pad2(bc1, 1, h)], axis=1)

    # fused head weight: output lanes [0, n_actions) -> logits, lane n_actions -> value
    wh = jnp.zeros((2 * h, out_p), jnp.float32)
    wh = wh.at[:hidden_dim, :n_actions].set(wa2)
    wh = wh.at[h:h + hidden_dim, n_actions].set(wc2[:, 0])
    bh = jnp.zeros((1, out_p), jnp.float32)
    bh = bh.at[0, :n_actions].set(ba2[0])
    bh = bh.at[0, n_actions].set(bc2[0, 0])

    return dict(
        w1=w1_p, b1=b1_p, wb=wb, bb=bb, wh=wh, bh=bh,
        n_actions=n_actions, d_in=d_in, h=h, out_p=out_p,
    )


def actor_critic_forward(x, prepared):
    """x: [B, input_dim] float32. prepared: output of prepare_params()."""
    B = x.shape[0]
    n_actions = prepared["n_actions"]
    d_in, h, out_p = prepared["d_in"], prepared["h"], prepared["out_p"]

    # batch tile: multiple of the 8-sublane quantum, capped at 128 rows per step
    TB = min(128, _round_up(B, SUBLANE))
    B_p = _round_up(B, TB)
    x_p = jnp.pad(x, ((0, B_p - B), (0, d_in - x.shape[1])))

    # VMEM budget: resident weights + double-buffered x/out tiles (+ slack for
    # intermediates).  Sized so we only ever ask for what we need -> safe on
    # v7x's 64 MiB per-TC VMEM as well as v5e/v6e's 128 MiB.
    f32 = 4
    weight_bytes = (d_in * h + h + h * 2 * h + 2 * h + 2 * h * out_p + out_p) * f32
    tile_bytes = 2 * (TB * d_in + TB * out_p) * f32
    scratch_bytes = (TB * h + TB * 2 * h + TB * out_p) * f32
    vmem_needed = 2 * (weight_bytes + tile_bytes + scratch_bytes) + (1 << 20)
    vmem_limit = int(max(32 * 1024 * 1024, min(vmem_needed, 60 * 1024 * 1024)))

    kernel = functools.partial(_actor_critic_kernel, n_actions=n_actions)

    out = pl.pallas_call(
        kernel,
        out_shape=jax.ShapeDtypeStruct((B_p, out_p), jnp.float32),
        grid=(B_p // TB,),
        in_specs=[
            pl.BlockSpec((TB, d_in), lambda i: (i, 0)),      # x: tiled over batch
            pl.BlockSpec((d_in, h), lambda i: (0, 0)),        # W1: resident
            pl.BlockSpec((1, h), lambda i: (0, 0)),           # b1
            pl.BlockSpec((h, 2 * h), lambda i: (0, 0)),       # fused branch W
            pl.BlockSpec((1, 2 * h), lambda i: (0, 0)),       # fused branch b
            pl.BlockSpec((2 * h, out_p), lambda i: (0, 0)),   # fused head W
            pl.BlockSpec((1, out_p), lambda i: (0, 0)),       # fused head b
        ],
        out_specs=pl.BlockSpec((TB, out_p), lambda i: (i, 0)),
        compiler_params=pltpu.CompilerParams(
            dimension_semantics=("parallel",),
            vmem_limit_bytes=vmem_limit,
        ),
    )(
        x_p,
        prepared["w1"], prepared["b1"],
        prepared["wb"], prepared["bb"],
        prepared["wh"], prepared["bh"],
    )

    probs = out[:B, :n_actions]
    value = out[:B, n_actions:n_actions + 1]
    return probs, value


def init_params(key, input_dim, hidden_dim, n_actions):
    """Deterministic synthetic init (uniform, roughly PyTorch Linear scale)."""
    def linear(k, fan_in, fan_out):
        kw, kb = jax.random.split(k)
        bound = 1.0 / jnp.sqrt(fan_in)
        w = jax.random.uniform(kw, (fan_in, fan_out), jnp.float32, -bound, bound)
        b = jax.random.uniform(kb, (1, fan_out), jnp.float32, -bound, bound)
        return w, b

    k1, k2, k3, k4, k5 = jax.random.split(key, 5)
    w1, b1 = linear(k1, input_dim, hidden_dim)
    wa1, ba1 = linear(k2, hidden_dim, hidden_dim)
    wa2, ba2 = linear(k3, hidden_dim, n_actions)
    wc1, bc1 = linear(k4, hidden_dim, hidden_dim)
    wc2, bc2 = linear(k5, hidden_dim, 1)
    return dict(w1=w1, b1=b1, wa1=wa1, ba1=ba1, wa2=wa2, ba2=ba2,
                wc1=wc1, bc1=bc1, wc2=wc2, bc2=bc2)


def reference_forward(x, p):
    shared = jnp.maximum(x @ p["w1"] + p["b1"], 0.0)
    ah = jnp.maximum(shared @ p["wa1"] + p["ba1"], 0.0)
    logits = ah @ p["wa2"] + p["ba2"]
    probs = jax.nn.softmax(logits, axis=-1)
    ch = jnp.maximum(shared @ p["wc1"] + p["bc1"], 0.0)
    value = ch @ p["wc2"] + p["bc2"]
    return probs, value


if __name__ == "__main__":
    B, INPUT_DIM, HIDDEN_DIM, N_ACTIONS = 8, 16, 32, 8

    key = jax.random.PRNGKey(0)
    kx, kp = jax.random.split(key)
    x = jax.random.normal(kx, (B, INPUT_DIM), jnp.float32)
    params = init_params(kp, INPUT_DIM, HIDDEN_DIM, N_ACTIONS)

    prepared = prepare_params(params)  # pad + fuse once, reuse across calls
    probs, value = jax.block_until_ready(actor_critic_forward(x, prepared))

    # sanity-check against a pure-JAX reference
    ref_probs, ref_value = reference_forward(x, params)
    assert probs.shape == (B, N_ACTIONS) and value.shape == (B, 1)
    assert jnp.allclose(probs, ref_probs, atol=1e-5, rtol=1e-5)
    assert jnp.allclose(value, ref_value, atol=1e-5, rtol=1e-5)
    assert jnp.allclose(jnp.sum(probs, axis=-1), 1.0, atol=1e-5)

    print("KERNEL_OK")
</pallas_src>

<mosaic_0001>
module attributes {stable_mosaic.version = 11 : i64} {
  func.func @_actor_critic_kernel(%arg0: i32, %arg1: memref<8x128xf32, #tpu.memory_space<vmem>>, %arg2: memref<128x128xf32, #tpu.memory_space<vmem>>, %arg3: memref<1x128xf32, #tpu.memory_space<vmem>>, %arg4: memref<128x256xf32, #tpu.memory_space<vmem>>, %arg5: memref<1x256xf32, #tpu.memory_space<vmem>>, %arg6: memref<256x128xf32, #tpu.memory_space<vmem>>, %arg7: memref<1x128xf32, #tpu.memory_space<vmem>>, %arg8: memref<8x128xf32, #tpu.memory_space<vmem>>) attributes {dimension_semantics = [#tpu.dimension_semantics<parallel>], iteration_bounds = array<i64: 1>, scalar_prefetch = 0 : i64, scratch_operands = 0 : i64, tpu.core_type = #tpu.core_type<tc>, window_params = [{transform_indices = @transform_0, window_bounds = array<i64: 8, 128>}, {pipeline_mode = #tpu.pipeline_mode<synchronous>, transform_indices = @transform_1, window_bounds = array<i64: 128, 128>}, {pipeline_mode = #tpu.pipeline_mode<synchronous>, transform_indices = @transform_2, window_bounds = array<i64: 1, 128>}, {pipeline_mode = #tpu.pipeline_mode<synchronous>, transform_indices = @transform_3, window_bounds = array<i64: 128, 256>}, {pipeline_mode = #tpu.pipeline_mode<synchronous>, transform_indices = @transform_4, window_bounds = array<i64: 1, 256>}, {pipeline_mode = #tpu.pipeline_mode<synchronous>, transform_indices = @transform_5, window_bounds = array<i64: 256, 128>}, {pipeline_mode = #tpu.pipeline_mode<synchronous>, transform_indices = @transform_6, window_bounds = array<i64: 1, 128>}, {transform_indices = @transform_7, window_bounds = array<i64: 8, 128>}]} {
    %c0 = arith.constant 0 : index
    %c0_0 = arith.constant 0 : index
    %0 = vector.load %arg1[%c0, %c0_0] : memref<8x128xf32, #tpu.memory_space<vmem>>, vector<8x128xf32>
    %c0_1 = arith.constant 0 : index
    %c0_2 = arith.constant 0 : index
    %1 = vector.load %arg2[%c0_1, %c0_2] : memref<128x128xf32, #tpu.memory_space<vmem>>, vector<128x128xf32>
    %cst = arith.constant dense<0.000000e+00> : vector<8x128xf32>
    %2 = tpu.matmul %0, %1, %cst {dimension_numbers = #tpu.dot_dimension_numbers<[1], [0], [0], [1], [0, 0, 1, 1], [], []>} : vector<8x128xf32>, vector<128x128xf32>, vector<8x128xf32> -> vector<8x128xf32>
    %c0_3 = arith.constant 0 : index
    %c0_4 = arith.constant 0 : index
    %3 = vector.load %arg3[%c0_3, %c0_4] : memref<1x128xf32, #tpu.memory_space<vmem>>, vector<1x128xf32>
    %4 = vector.broadcast %3 : vector<1x128xf32> to vector<8x128xf32>
    %5 = arith.addf %2, %4 : vector<8x128xf32>
    %cst_5 = arith.constant 0.000000e+00 : f32
    %6 = vector.broadcast %cst_5 : f32 to vector<8x128xf32>
    %7 = arith.maximumf %5, %6 : vector<8x128xf32>
    %c0_6 = arith.constant 0 : index
    %c0_7 = arith.constant 0 : index
    %8 = vector.load %arg4[%c0_6, %c0_7] : memref<128x256xf32, #tpu.memory_space<vmem>>, vector<128x256xf32>
    %cst_8 = arith.constant dense<0.000000e+00> : vector<8x256xf32>
    %9 = tpu.matmul %7, %8, %cst_8 {dimension_numbers = #tpu.dot_dimension_numbers<[1], [0], [0], [1], [0, 0, 1, 1], [], []>} : vector<8x128xf32>, vector<128x256xf32>, vector<8x256xf32> -> vector<8x256xf32>
    %c0_9 = arith.constant 0 : index
    %c0_10 = arith.constant 0 : index
    %10 = vector.load %arg5[%c0_9, %c0_10] : memref<1x256xf32, #tpu.memory_space<vmem>>, vector<1x256xf32>
    %11 = vector.broadcast %10 : vector<1x256xf32> to vector<8x256xf32>
    %12 = arith.addf %9, %11 : vector<8x256xf32>
    %cst_11 = arith.constant 0.000000e+00 : f32
    %13 = vector.broadcast %cst_11 : f32 to vector<8x256xf32>
    %14 = arith.maximumf %12, %13 : vector<8x256xf32>
    %c0_12 = arith.constant 0 : index
    %c0_13 = arith.constant 0 : index
    %15 = vector.load %arg6[%c0_12, %c0_13] : memref<256x128xf32, #tpu.memory_space<vmem>>, vector<256x128xf32>
    %cst_14 = arith.constant dense<0.000000e+00> : vector<8x128xf32>
    %16 = tpu.matmul %14, %15, %cst_14 {dimension_numbers = #tpu.dot_dimension_numbers<[1], [0], [0], [1], [0, 0, 1, 1], [], []>} : vector<8x256xf32>, vector<256x128xf32>, vector<8x128xf32> -> vector<8x128xf32>
    %c0_15 = arith.constant 0 : index
    %c0_16 = arith.constant 0 : index
    %17 = vector.load %arg7[%c0_15, %c0_16] : memref<1x128xf32, #tpu.memory_space<vmem>>, vector<1x128xf32>
    %18 = vector.broadcast %17 : vector<1x128xf32> to vector<8x128xf32>
    %19 = arith.addf %16, %18 : vector<8x128xf32>
    %20 = tpu.iota {dimensions = array<i32: 1>} : vector<8x128xi32>
    %c8_i32 = arith.constant 8 : i32
    %21 = vector.broadcast %c8_i32 : i32 to vector<8x128xi32>
    %22 = arith.cmpi slt, %20, %21 : vector<8x128xi32>
    %c8_i32_17 = arith.constant 8 : i32
    %23 = vector.broadcast %c8_i32_17 : i32 to vector<8x128xi32>
    %24 = arith.cmpi eq, %20, %23 : vector<8x128xi32>
    %cst_18 = arith.constant 0xFF800000 : f32
    %25 = vector.broadcast %cst_18 : f32 to vector<8x128xf32>
    %26 = arith.select %22, %19, %25 : vector<8x128xi1>, vector<8x128xf32>
    %cst_19 = arith.constant dense<0xFF800000> : vector<8xf32>
    %27 = vector.multi_reduction <maximumf>, %26, %cst_19 [1] : vector<8x128xf32> to vector<8xf32>
    %28 = vector.shape_cast %27 : vector<8xf32> to vector<8x1xf32>
    %29 = vector.broadcast %28 : vector<8x1xf32> to vector<8x128xf32>
    %30 = arith.subf %26, %29 : vector<8x128xf32>
    %31 = math.exp %30 : vector<8x128xf32>
    %cst_20 = arith.constant dense<0.000000e+00> : vector<8xf32>
    %32 = vector.multi_reduction <add>, %31, %cst_20 [1] : vector<8x128xf32> to vector<8xf32>
    %33 = vector.shape_cast %32 : vector<8xf32> to vector<8x1xf32>
    %34 = tpu.reciprocal %33 : vector<8x1xf32> -> vector<8x1xf32>
    %35 = vector.broadcast %34 : vector<8x1xf32> to vector<8x128xf32>
    %36 = arith.mulf %31, %35 : vector<8x128xf32>
    %37 = arith.select %24, %19, %36 : vector<8x128xi1>, vector<8x128xf32>
    %c0_21 = arith.constant 0 : index
    %c0_22 = arith.constant 0 : index
    %38 = vector.load %arg8[%c0_21, %c0_22] : memref<8x128xf32, #tpu.memory_space<vmem>>, vector<8x128xf32>
    tpu.vector_store %arg8[%c0_21, %c0_22], %37 {strides = array<i32>} : memref<8x128xf32, #tpu.memory_space<vmem>>, vector<8x128xf32>,
    return
  }
  func.func @transform_0(%arg0: i32) -> (i32, i32) {
    %c0_i32 = arith.constant 0 : i32
    %c0_i32_0 = arith.constant 0 : i32
    return %arg0, %c0_i32 : i32, i32
  }
  func.func @transform_1(%arg0: i32) -> (i32, i32) {
    %c0_i32 = arith.constant 0 : i32
    %c0_i32_0 = arith.constant 0 : i32
    %c0_i32_1 = arith.constant 0 : i32
    return %c0_i32, %c0_i32_0 : i32, i32
  }
  func.func @transform_2(%arg0: i32) -> (i32, i32) {
    %c0_i32 = arith.constant 0 : i32
    %c0_i32_0 = arith.constant 0 : i32
    %c0_i32_1 = arith.constant 0 : i32
    return %c0_i32, %c0_i32_0 : i32, i32
  }
  func.func @transform_3(%arg0: i32) -> (i32, i32) {
    %c0_i32 = arith.constant 0 : i32
    %c0_i32_0 = arith.constant 0 : i32
    %c0_i32_1 = arith.constant 0 : i32
    return %c0_i32, %c0_i32_0 : i32, i32
  }
  func.func @transform_4(%arg0: i32) -> (i32, i32) {
    %c0_i32 = arith.constant 0 : i32
    %c0_i32_0 = arith.constant 0 : i32
    %c0_i32_1 = arith.constant 0 : i32
    return %c0_i32, %c0_i32_0 : i32, i32
  }
  func.func @transform_5(%arg0: i32) -> (i32, i32) {
    %c0_i32 = arith.constant 0 : i32
    %c0_i32_0 = arith.constant 0 : i32
    %c0_i32_1 = arith.constant 0 : i32
    return %c0_i32, %c0_i32_0 : i32, i32
  }
  func.func @transform_6(%arg0: i32) -> (i32, i32) {
    %c0_i32 = arith.constant 0 : i32
    %c0_i32_0 = arith.constant 0 : i32
    %c0_i32_1 = arith.constant 0 : i32
    return %c0_i32, %c0_i32_0 : i32, i32
  }
  func.func @transform_7(%arg0: i32) -> (i32, i32) {
    %c0_i32 = arith.constant 0 : i32
    %c0_i32_0 = arith.constant 0 : i32
    return %arg0, %c0_i32 : i32, i32
  }
}

</mosaic_0001>

<bundles_post_ra>
// kernel: tpu_custom_call.1
= control target key start
LH: loop header
LB: loop body
LE: loop exit
PB: predicated region body
PF: predicated region fallthrough
CT: control target
= control target key end

     0   :  { %12 = vsyncpa [#allocation3], 0  ;;  %s550_s0 = inlined_call_operand.hbm [shape: f32[8,128], index: 0, kind: input, shape index: {}]   ;;  %s551_s1 = inlined_call_operand.hbm [shape: f32[128,128], index: 1, kind: input, shape index: {}]   ;;  %s552_s2 = inlined_call_operand.vmem [shape: f32[1,128], index: 2, kind: input, shape index: {}]   ;;  %s553_s3 = inlined_call_operand.hbm [shape: f32[128,256], index: 3, kind: input, shape index: {}]   ;;  %s554_s4 = inlined_call_operand.vmem [shape: f32[1,256], index: 4, kind: input, shape index: {}]   ;;  %s555_s5 = inlined_call_operand.hbm [shape: f32[256,128], index: 5, kind: input, shape index: {}]   ;;  %s556_s6 = inlined_call_operand.vmem [shape: f32[1,128], index: 6, kind: input, shape index: {}]   ;;  %s557_s7 = inlined_call_operand.hbm [shape: f32[8,128], index: 7, kind: output, shape index: {}]  }
   0x1   :  { %13 = vsyncpa [#allocation6], 0 }
   0x2   :  { %14 = vsyncpa [#allocation9], 0  ;;  %s31_s26 = sshll.u32 %s551_s1, 4  ;;  %s32_s26 = int_to_ptr.hbm [resolvable:$true] %s31_s26 }
   0x3   :  { %15 = vsyncpa [#allocation4], 0  ;;  %s477_s27 = smov [#allocation5]   ;;  %s21_s8 = sshll.u32 %s550_s0, 4  ;;  %s22_s8 = int_to_ptr.hbm [resolvable:$true] %s21_s8 }
   0x4   :  { %s33_s28 = sshll.u32 %s477_s27, 4  ;;  %s478_s9 = smov 128   ;;  %s34_s28 = int_to_ptr.vmem [resolvable:$true] %s33_s28 }
   0x5   :  { %s479_s10 = smov 8   ;;  %s480_s11 = smov [#allocation2]  }
   0x6   :  { %39 = dma.hbm_to_vmem [thread:$0]  %s32_s26, 2048, %s34_s28, [#allocation6], %s478_s9, %s478_s9, %s479_s10  }
   0x7   :  { %s23_s12 = sshll.u32 %s480_s11, 4  ;;  %s46_s15 = sshll.u32 %s553_s3, 4  ;;  %s24_s12 = int_to_ptr.vmem [resolvable:$true] %s23_s12  ;;  %s47_s15 = int_to_ptr.hbm [resolvable:$true] %s46_s15 }
   0x8   :  { %26 = dma.hbm_to_vmem [thread:$0]  %s22_s8, 128, %s24_s12, [#allocation3]  }
   0x9   :  { %s481_s1 = smov [#allocation7]   ;;  %s61_s0 = sshll.u32 %s555_s5, 4  ;;  %s62_s0 = int_to_ptr.hbm [resolvable:$true] %s61_s0 }
   0xa   :  { %s48_s16 = sshll.u32 %s481_s1, 4  ;;  %s482_s19 = smov 256   ;;  %s49_s16 = int_to_ptr.vmem [resolvable:$true] %s48_s16 }
   0xb   :  { %s483_s20 = smov 16   ;;  %s484_s21 = smov [#allocation8]  }
   0xc   :  { %54 = dma.hbm_to_vmem [thread:$0]  %s47_s15, 4096, %s49_s16, [#allocation6], %s482_s19, %s482_s19, %s483_s20  }
   0xd   :  { %s63_s22 = sshll.u32 %s484_s21, 4  ;;  %s64_s22 = int_to_ptr.vmem [resolvable:$true] %s63_s22 }
   0xe   :  { %69 = dma.hbm_to_vmem [thread:$0]  %s62_s0, 4096, %s64_s22, [#allocation9], %s478_s9, %s478_s9, %s479_s10  }
   0xf   :  { %469 = dma.done.wait [#allocation3], 128  }
  0x10   :  { %470 = vsyncadd [#allocation3], 4294967168 }
  0x11   :  { %471 = dma.done.wait [#allocation6], 6144  }
  0x12   :  { %472 = vsyncadd [#allocation6], 4294961152 }
  0x13   :  { %473 = dma.done.wait [#allocation9], 4096  }
  0x14   :  { %474 = vsyncadd [#allocation9], 4294963200  ;;  %v104_v0 = vld [vmem:[#allocation5 + $0x78] sm:$0xff]  ;;  %v103_v1 = vld [vmem:[#allocation5 + $0x70] sm:$0xff]  ;;  %s322_s28 = sshll.u32 %s557_s7, 4  ;;  %s323_s28 = int_to_ptr.hbm [resolvable:$true] %s322_s28 }
  0x15   :  { %109 = vmatpush.msra.mxu0 %v104_v0  ;;  %v102_v2 = vld [vmem:[#allocation5 + $0x68] sm:$0xff]  ;;  %v101_v3 = vld [vmem:[#allocation5 + $0x60] sm:$0xff]  ;;  %v100_v4 = vld [vmem:[#allocation5 + $0x58] sm:$0xff] }
  0x16   :  { %v160_v5 = vld [vmem:[#allocation7 + $0xf0] sm:$0xff]  ;;  %v161_v6 = vld [vmem:[#allocation7 + $0xf8] sm:$0xff]  ;;  %v158_v7 = vld [vmem:[#allocation7 + $0xe0] sm:$0xff] }
  0x17   :  { %110 = vmatpush.msra.mxu0 %v103_v1  ;;  %168 = vmatpush.msra.mxu1 %v160_v5  ;;  %v159_v8 = vld [vmem:[#allocation7 + $0xe8] sm:$0xff]  ;;  %v156_v9 = vld [vmem:[#allocation7 + $0xd0] sm:$0xff]  ;;  %v157_v11 = vld [vmem:[#allocation7 + $0xd8] sm:$0xff] }
  0x18   :  { %188 = vmatpush.msra.mxu2 %v161_v6  ;;  %v99_v10 = vld [vmem:[#allocation5 + $0x50] sm:$0xff]  ;;  %v154_v12 = vld [vmem:[#allocation7 + $0xc0] sm:$0xff]  ;;  %v98_v13 = vld [vmem:[#allocation5 + $0x48] sm:$0xff] }
  0x19   :  { %111 = vmatpush.msra.mxu0 %v102_v2  ;;  %169 = vmatpush.msra.mxu1 %v158_v7  ;;  %v155_v14 = vld [vmem:[#allocation7 + $0xc8] sm:$0xff]  ;;  %v152_v15 = vld [vmem:[#allocation7 + $0xb0] sm:$0xff]  ;;  %v97_v16 = vld [vmem:[#allocation5 + $0x40] sm:$0xff] }
  0x1a   :  { %189 = vmatpush.msra.mxu2 %v159_v8  ;;  %v153_v17 = vld [vmem:[#allocation7 + $0xb8] sm:$0xff]  ;;  %v150_v18 = vld [vmem:[#allocation7 + $0xa0] sm:$0xff]  ;;  %v151_v20 = vld [vmem:[#allocation7 + $0xa8] sm:$0xff] }
  0x1b   :  { %112 = vmatpush.msra.mxu0 %v101_v3  ;;  %170 = vmatpush.msra.mxu1 %v156_v9  ;;  %v96_v19 = vld [vmem:[#allocation5 + $0x38] sm:$0xff]  ;;  %v148_v21 = vld [vmem:[#allocation7 + $0x90] sm:$0xff]  ;;  %v146_v24 = vld [vmem:[#allocation7 + $0x80] sm:$0xff] }
  0x1c   :  { %190 = vmatpush.msra.mxu2 %v157_v11  ;;  %v95_v22 = vld [vmem:[#allocation5 + $0x30] sm:$0xff]  ;;  %v149_v23 = vld [vmem:[#allocation7 + $0x98] sm:$0xff]  ;;  %v94_v25 = vld [vmem:[#allocation5 + $0x28] sm:$0xff] }
  0x1d   :  { %113 = vmatpush.msra.mxu0 %v100_v4  ;;  %171 = vmatpush.msra.mxu1 %v154_v12  ;;  %v147_v26 = vld [vmem:[#allocation7 + $0x88] sm:$0xff]  ;;  %v144_v27 = vld [vmem:[#allocation7 + $0x70] sm:$0xff]  ;;  %v93_v28 = vld [vmem:[#allocation5 + $0x20] sm:$0xff] }
  0x1e   :  { %191 = vmatpush.msra.mxu2 %v155_v14  ;;  %v145_v29 = vld [vmem:[#allocation7 + $0x78] sm:$0xff]  ;;  %v142_v30 = vld [vmem:[#allocation7 + $0x60] sm:$0xff]  ;;  %v143_v32 = vld [vmem:[#allocation7 + $0x68] sm:$0xff] }
  0x1f   :  { %114 = vmatpush.msra.mxu0 %v99_v10  ;;  %172 = vmatpush.msra.mxu1 %v152_v15  ;;  %v92_v31 = vld [vmem:[#allocation5 + $0x18] sm:$0xff]  ;;  %v140_v33 = vld [vmem:[#allocation7 + $0x50] sm:$0xff]  ;;  %v138_v36 = vld [vmem:[#allocation7 + $0x40] sm:$0xff] }
  0x20   :  { %192 = vmatpush.msra.mxu2 %v153_v17  ;;  %v91_v34 = vld [vmem:[#allocation5 + $0x10] sm:$0xff]  ;;  %v141_v35 = vld [vmem:[#allocation7 + $0x58] sm:$0xff]  ;;  %v90_v37 = vld [vmem:[#allocation5 + $0x8] sm:$0xff] }
  0x21   :  { %115 = vmatpush.msra.mxu0 %v98_v13  ;;  %173 = vmatpush.msra.mxu1 %v150_v18  ;;  %v139_v38 = vld [vmem:[#allocation7 + $0x48] sm:$0xff]  ;;  %v136_v39 = vld [vmem:[#allocation7 + $0x30] sm:$0xff]  ;;  %v89_v40 = vld [vmem:[#allocation5] sm:$0xff] }
  0x22   :  { %193 = vmatpush.msra.mxu2 %v151_v20  ;;  %v137_v41 = vld [vmem:[#allocation7 + $0x38] sm:$0xff]  ;;  %v134_v43 = vld [vmem:[#allocation7 + $0x20] sm:$0xff]  ;;  %v135_v44 = vld [vmem:[#allocation7 + $0x28] sm:$0xff] }
  0x23   :  { %116 = vmatpush.msra.mxu0 %v97_v16  ;;  %174 = vmatpush.msra.mxu1 %v148_v21  ;;  %v88_v42 = vld [vmem:[#allocation2] sm:$0xff]  ;;  %v132_v45 = vld [vmem:[#allocation7 + $0x10] sm:$0xff]  ;;  %v130_v47 = vld [vmem:[#allocation7] sm:$0xff] }
  0x24   :  { %194 = vmatpush.msra.mxu2 %v149_v23  ;;  %v133_v46 = vld [vmem:[#allocation7 + $0x18] sm:$0xff]  ;;  %v131_v48 = vld [vmem:[#allocation7 + $0x8] sm:$0xff]  ;;  %v224_v50 = vld [vmem:[#allocation8 + $0x70] sm:$0xff] }
  0x25   :  { %117 = vmatpush.msra.mxu0 %v96_v19  ;;  %175 = vmatpush.msra.mxu1 %v146_v24  ;;  %v225_v49 = vld [vmem:[#allocation8 + $0x78] sm:$0xff]  ;;  %v223_v52 = vld [vmem:[#allocation8 + $0x68] sm:$0xff]  ;;  %v240_v53 = vld [vmem:[#allocation8 + $0xf0] sm:$0xff] }
  0x26   :  { %195 = vmatpush.msra.mxu2 %v147_v26  ;;  %246 = vmatpush.msra.mxu3 %v225_v49  ;;  %v241_v51 = vld [vmem:[#allocation8 + $0xf8] sm:$0xff]  ;;  %v239_v54 = vld [vmem:[#allocation8 + $0xe8] sm:$0xff]  ;;  %v222_v55 = vld [vmem:[#allocation8 + $0x60] sm:$0xff] }
  0x27   :  { %118 = vmatpush.msra.mxu0 %v95_v22  ;;  %176 = vmatpush.msra.mxu1 %v144_v27  ;;  %v238_v56 = vld [vmem:[#allocation8 + $0xe0] sm:$0xff]  ;;  %v221_v57 = vld [vmem:[#allocation8 + $0x58] sm:$0xff]  ;;  %v220_v59 = vld [vmem:[#allocation8 + $0x50] sm:$0xff] }
  0x28   :  { %196 = vmatpush.msra.mxu2 %v145_v29  ;;  %247 = vmatpush.msra.mxu3 %v224_v50  ;;  %v237_v58 = vld [vmem:[#allocation8 + $0xd8] sm:$0xff]  ;;  %v236_v60 = vld [vmem:[#allocation8 + $0xd0] sm:$0xff]  ;;  %v219_v61 = vld [vmem:[#allocation8 + $0x48] sm:$0xff] }
  0x29   :  { %119 = vmatpush.msra.mxu0 %v94_v25  ;;  %177 = vmatpush.msra.mxu1 %v142_v30  ;;  %v235_v62 = vld [vmem:[#allocation8 + $0xc8] sm:$0xff]  ;;  %v218_v63 = vld [vmem:[#allocation8 + $0x40] sm:$0xff]  ;;  %v217_v1 = vld [vmem:[#allocation8 + $0x38] sm:$0xff]  ;;  %v286_v30 = vlaneseq }
  0x2a   :  { %197 = vmatpush.msra.mxu2 %v143_v32  ;;  %248 = vmatpush.msra.mxu3 %v223_v52  ;;  %v234_v0 = vld [vmem:[#allocation8 + $0xc0] sm:$0xff]  ;;  %v233_v2 = vld [vmem:[#allocation8 + $0xb8] sm:$0xff]  ;;  %v216_v3 = vld [vmem:[#allocation8 + $0x30] sm:$0xff] }
  0x2b   :  { %120 = vmatpush.msra.mxu0 %v93_v28  ;;  %178 = vmatpush.msra.mxu1 %v140_v33  ;;  %v232_v4 = vld [vmem:[#allocation8 + $0xb0] sm:$0xff]  ;;  %v215_v5 = vld [vmem:[#allocation8 + $0x28] sm:$0xff]  ;;  %v214_v6 = vld [vmem:[#allocation8 + $0x20] sm:$0xff]  ;;  %v287_v32 = vand.u32 127, %v286_v30 }
  0x2c   :  { %198 = vmatpush.msra.mxu2 %v141_v35  ;;  %249 = vmatpush.msra.mxu3 %v222_v55  ;;  %v213_v7 = vld [vmem:[#allocation8 + $0x18] sm:$0xff]  ;;  %v212_v12 = vld [vmem:[#allocation8 + $0x10] sm:$0xff]  ;;  %v231_v13 = vld [vmem:[#allocation8 + $0xa8] sm:$0xff] }
  0x2d   :  { %121 = vmatpush.msra.mxu0 %v92_v31  ;;  %179 = vmatpush.msra.mxu1 %v138_v36  ;;  %v343_v8 = vld [vmem:[%s552_s2] ss:$0 sm:$0xff]  ;;  %v211_v14 = vld [vmem:[#allocation8 + $0x8] sm:$0xff]  ;;  %v230_v15 = vld [vmem:[#allocation8 + $0xa0] sm:$0xff]  ;;  %vm288_vm0 = vcmp.lt.s32.totalorder %v287_v32, 8  ;;  %vm289_vm5 = vcmp.eq.s32.totalorder %v287_v32, 8 }
  0x2e   :  { %199 = vmatpush.msra.mxu2 %v139_v38  ;;  %250 = vmatpush.msra.mxu3 %v221_v57  ;;  %v210_v16 = vld [vmem:[#allocation8] sm:$0xff]  ;;  %v229_v17 = vld [vmem:[#allocation8 + $0x98] sm:$0xff]  ;;  %v228_v18 = vld [vmem:[#allocation8 + $0x90] sm:$0xff] }
  0x2f   :  { %122 = vmatpush.msra.mxu0 %v91_v34  ;;  %180 = vmatpush.msra.mxu1 %v136_v39  ;;  %v227_v19 = vld [vmem:[#allocation8 + $0x88] sm:$0xff]  ;;  %v226_v20 = vld [vmem:[#allocation8 + $0x80] sm:$0xff]  ;;  %v162_v21 = vld [vmem:[%s554_s4] sm:$0x3]  ;;  %s485_s4 = smov [#allocation10]  }
  0x30   :  { %200 = vmatpush.msra.mxu2 %v137_v41  ;;  %251 = vmatpush.msra.mxu3 %v220_v59  ;;  %v164_v22 = vperm.slane %v162_v21, 0  ;;  %v165_v26 = vperm.slane %v162_v21, 1  ;;  %v344_v31 = vld [vmem:[%s556_s6] ss:$0 sm:$0xff]  ;;  %s320_s6 = sshll.u32 %s485_s4, 4  ;;  %s321_s6 = int_to_ptr.vmem [resolvable:$true] %s320_s6 }
  0x31   :  { %123 = vmatpush.msra.mxu0 %v90_v37  ;;  %181 = vmatpush.msra.mxu1 %v134_v43 }
  0x32   :  { %201 = vmatpush.msra.mxu2 %v135_v44  ;;  %252 = vmatpush.msra.mxu3 %v219_v61 }
  0x33   :  { %124 = vmatpush.msra.mxu0 %v89_v40  ;;  %182 = vmatpush.msra.mxu1 %v132_v45 }
  0x34   :  { %125 = vmatmul.f32.vlgmr.msra.gmra.mxu0 %v88_v42  ;;  %202 = vmatpush.msra.mxu2 %v133_v46 }
  0x35   :  { %183 = vmatpush.msra.mxu1 %v130_v47  ;;  %266 = vmatpush.msrb.mxu0 %v241_v51 }
  0x36   :  { %203 = vmatpush.msra.mxu2 %v131_v48  ;;  %253 = vmatpush.msra.mxu3 %v218_v63 }
  0x37   :  { %267 = vmatpush.msrb.mxu0 %v240_v53 }
  0x38   :  { %254 = vmatpush.msra.mxu3 %v217_v1 }
  0x39   :  { %268 = vmatpush.msrb.mxu0 %v239_v54 }
  0x3a   :  { %255 = vmatpush.msra.mxu3 %v216_v3 }
  0x3b   :  { %269 = vmatpush.msrb.mxu0 %v238_v56 }
  0x3c   :  { %256 = vmatpush.msra.mxu3 %v215_v5 }
  0x3d   :  { %270 = vmatpush.msrb.mxu0 %v237_v58 }
  0x3e   :  { %257 = vmatpush.msra.mxu3 %v214_v6 }
  0x3f   :  { %271 = vmatpush.msrb.mxu0 %v236_v60 }
  0x40   :  { %258 = vmatpush.msra.mxu3 %v213_v7 }
  0x41   :  { %272 = vmatpush.msrb.mxu0 %v235_v62 }
  0x42   :  { %259 = vmatpush.msra.mxu3 %v212_v12 }
  0x43   :  { %273 = vmatpush.msrb.mxu0 %v234_v0 }
  0x44   :  { %260 = vmatpush.msra.mxu3 %v211_v14 }
  0x45   :  { %274 = vmatpush.msrb.mxu0 %v233_v2 }
  0x46   :  { %261 = vmatpush.msra.mxu3 %v210_v16 }
  0x47   :  { %275 = vmatpush.msrb.mxu0 %v232_v4 }
  0x49   :  { %276 = vmatpush.msrb.mxu0 %v231_v13 }
  0x4b   :  { %277 = vmatpush.msrb.mxu0 %v230_v15 }
  0x4d   :  { %278 = vmatpush.msrb.mxu0 %v229_v17 }
  0x4f   :  { %279 = vmatpush.msrb.mxu0 %v228_v18 }
  0x51   :  { %280 = vmatpush.msrb.mxu0 %v227_v19 }
  0x53   :  { %281 = vmatpush.msrb.mxu0 %v226_v20 }
  0xb1   :  { %v126_v9 = vpop.f32.mrf.mxu0 }
  0xb2   :  { %v127_v10 = vadd.f32 %v343_v8, %v126_v9 }
  0xb4   :  { %v129_v11 = vmax.f32 %v127_v10, 0.0 }
  0xb6   :  { %184 = vmatmul.f32.vlgmr.msra.gmra.mxu1 %v129_v11  ;;  %204 = vmatmul.f32.vlgmr.msra.gmra.mxu2 %v129_v11 }
 0x133   :  { %v185_v23 = vpop.f32.mrf.mxu1 }
 0x134   :  { %v186_v24 = vadd.f32 %v185_v23, %v164_v22 }
 0x136   :  { %v208_v25 = vmax.f32 %v186_v24, 0.0 }
 0x138   :  { %262 = vmatmul.f32.vlgmr.msra.gmra.mxu3 %v208_v25 }
 0x139   :  { %v205_v27 = vpop.f32.mrf.mxu2 }
 0x13a   :  { %v206_v28 = vadd.f32 %v205_v27, %v165_v26 }
 0x13c   :  { %v209_v29 = vmax.f32 %v206_v28, 0.0 }
 0x13e   :  { %282 = vmatmul.f32.vlgmr.msrb.gmra.mxu0 %v209_v29 }
 0x1bb   :  { %v263_v33 = vpop.f32.mrf.mxu3  ;;  %v283_v35 = vpop.f32.mrf.mxu0 }
 0x1bc   :  { %v264_v34 = vadd.f32 %v344_v31, %v263_v33 }
 0x1be   :  { %v284_v36 = vadd.f32 %v283_v35, %v264_v34 }
 0x1c0   :  { %v290_v37 = vsel %vm288_vm0, %v284_v36, -inf }
 0x1c1   :  { %291 = vmax.xlane.f32.xlu0 %v290_v37 }
 0x234   :  { %v292_v38 = vpop.xlane.xlu0 %291 }
 0x235   :  { %v293_v39 = vsub.f32 %v290_v37, %v292_v38 }
 0x237   :  { %v294_v40 = vmul.f32 1.442695, %v293_v39 }
 0x239   :  { %345 = vpow2.f32 %v294_v40 }
 0x23f   :  { %v346_v41 = vpop.eup %345 }
 0x240   :  { %296 = vadd.xlane.f32.xlu0 %v346_v41 }
 0x2b3   :  { %v297_v42 = vpop.xlane.xlu0 %296 }
 0x2b4   :  { %347 = vrcp.f32 %v297_v42  ;;  %v309_v46 = vand.u32 2147483648, %v297_v42  ;;  %v307_v48 = vand.u32 2147483647, %v297_v42  ;;  %vm303_vm2 = vweird.f32 %v297_v42 }
 0x2b6   :  { %v310_v50 = vor.u32 1.1754944e-38, %v309_v46  ;;  %vm308_vm4 = vcmp.eq.f32.partialorder %v307_v48, 8.507059e+37 }
 0x2ba   :  { %v348_v43 = vpop.eup %347 }
 0x2bb   :  { %v299_v44 = vmul.f32 %v348_v43, %v297_v42  ;;  %vm304_vm1 = vweird.f32 %v348_v43 }
 0x2bc   :  { %vm305_vm3 = vmor %vm303_vm2, %vm304_vm1 }
 0x2bd   :  { %v300_v45 = vsub.f32 1.0, %v299_v44 }
 0x2bf   :  { %v301_v47 = vmul.f32 %v348_v43, %v300_v45 }
 0x2c1   :  { %v302_v49 = vadd.f32 %v348_v43, %v301_v47 }
 0x2c3   :  { %v306_v51 = vsel %vm305_vm3, %v348_v43, %v302_v49 }
 0x2c4   :  { %v311_v52 = vsel %vm308_vm4, %v310_v50, %v306_v51 }
 0x2c5   :  { %v312_v53 = vmul.f32 %v346_v41, %v311_v52 }
 0x2c7   :  { %v313_v54 = vsel %vm289_vm5, %v284_v36, %v312_v53 }
 0x2c8   :  { %314 = vst [vmem:[#allocation10] sm:$0xff] %v313_v54 }
 0x2c9   :  { %325 = dma.vmem_to_hbm [thread:$0]  %s321_s6, 128, %s323_s28, [#allocation4]  }
 0x2ca   :  { %475 = dma.done.wait [#allocation4], 128  }
 0x2cb   :  { %476 = vsyncadd [#allocation4], 4294967168 }
 0x2cc   :  { %330 = vsyncpa [#allocation3], 1 }
 0x2cd   :  { %331 = vsyncpa [#allocation6], 1 }
 0x2ce   :  { %332 = vsyncpa [#allocation9], 1 }
 0x2cf   :  { %333 = vsyncpa [#allocation4], 1 }

</bundles_post_ra>
